<compile_context>
chip_gen: v5e
topology: v5e:2x2
jax: 0.10.0
libtpu: 0.0.40
codegen_flags: <defaults>
</compile_context>

<pallas_src>
import jax
import jax.numpy as jnp
from jax.experimental import pallas as pl
from jax.experimental.pallas import tpu as pltpu

MAX_TB = 1024          # max batch-tile rows (amortizes per-step overhead)
PAD_HID = 128          # fc2 output padded to a lane-dense 128
PAD_CLS = 128          # fc3 output padded to a lane-dense 128
NEG_BIG = -1e30        # f32 bias sentinel for padded logit lanes (exp -> 0)


def mlp_kernel(x_ref, w1_ref, b1_ref, w2_ref, b2_ref, w3_ref, b3_ref, out_ref):
    # x tile arrives as f32; cast to bf16 in-kernel (no wrapper HBM pass).
    x = x_ref[...].astype(jnp.bfloat16)

    # fc1 + ReLU (bf16 MXU, f32 accumulate, f32 elementwise)
    h1 = jnp.dot(x, w1_ref[...], preferred_element_type=jnp.float32)
    h1 = jnp.maximum(h1 + b1_ref[...], 0.0)
    # TODO(synk): dropout(p=0.2) is identity in eval mode; training-mode mask
    # (via pltpu.prng_random_bits) intentionally omitted.

    # fc2 + ReLU (output dim zero-padded 64 -> 128; padded lanes stay 0)
    h2 = jnp.dot(h1.astype(jnp.bfloat16), w2_ref[...],
                 preferred_element_type=jnp.float32)
    h2 = jnp.maximum(h2 + b2_ref[...], 0.0)

    # fc3 (padded to 128 lanes) + softmax over the class dim
    logits = jnp.dot(h2.astype(jnp.bfloat16), w3_ref[...],
                     preferred_element_type=jnp.float32)
    logits = logits + b3_ref[...]              # padded lanes ~= -1e30 (f32)
    m = jnp.max(logits, axis=-1, keepdims=True)
    e = jnp.exp(logits - m)                    # padded lanes underflow to 0
    denom = jnp.sum(e, axis=-1, keepdims=True)
    out_ref[...] = (e * pl.reciprocal(denom, approx=True)).astype(out_ref.dtype)


def my_awesome_model_forward(x_nchw, params, *, return_padded=False):
    """x_nchw: (B, 1, 28, 28) float32 -> (B, 10) bf16 softmax probs.

    With return_padded=True, returns the lane-dense (B, 128) bf16 slab
    (classes >= 10 are exactly 0) so downstream code can avoid the slice pass.
    """
    w1, b1, w2, b2, w3, b3 = params
    B = x_nchw.shape[0]
    in_dim = w1.shape[0]                                   # 784
    n_cls = w3.shape[1]                                    # 10
    h2_dim = w2.shape[1]                                   # 64

    # Flatten like x.view(B, -1). Keep f32 (bf16 cast happens in-kernel).
    x = x_nchw.reshape(B, -1)

    # Batch tiling: no jnp.pad of x. For small B, one full-array block; for
    # large B, TB=1024 (mult. of 8) and Pallas masks the ragged last tile.
    TB = B if B <= MAX_TB else MAX_TB
    n_tiles = pl.cdiv(B, TB)

    # Lane-dense padding of the small, VMEM-resident weights (no HBM cost).
    # w2/b2 padded with zeros -> ReLU(0)=0 in padded h2 lanes; w3 padded rows
    # are zeros; b3 padded lanes get NEG_BIG so softmax ignores them.
    w2p = jnp.pad(w2, ((0, 0), (0, PAD_HID - h2_dim)))
    b2p = jnp.pad(b2, ((0, 0), (0, PAD_HID - h2_dim)))
    w3p = jnp.pad(w3, ((0, PAD_HID - h2_dim), (0, PAD_CLS - n_cls)))
    b3p = jnp.pad(b3, ((0, 0), (0, PAD_CLS - n_cls)), constant_values=NEG_BIG)

    w1b = w1.astype(jnp.bfloat16)
    w2b = w2p.astype(jnp.bfloat16)
    w3b = w3p.astype(jnp.bfloat16)
    b1f = b1.astype(jnp.float32)
    b2f = b2p.astype(jnp.float32)
    b3f = b3p.astype(jnp.float32)                          # keep f32 (NEG_BIG safe)

    flops = 2 * B * (in_dim * 128 + 128 * PAD_HID + PAD_HID * PAD_CLS)
    bytes_accessed = (x.size * 4                           # f32 x read
                      + (w1b.size + w2b.size + w3b.size) * 2
                      + (b1f.size + b2f.size + b3f.size) * 4
                      + B * PAD_CLS * 2)                   # bf16 output write

    out = pl.pallas_call(
        mlp_kernel,
        out_shape=jax.ShapeDtypeStruct((B, PAD_CLS), jnp.bfloat16),
        grid_spec=pltpu.PrefetchScalarGridSpec(
            num_scalar_prefetch=0,
            grid=(n_tiles,),
            in_specs=[
                # streamed per batch tile (f32, cast in-kernel)
                pl.BlockSpec((TB, in_dim), lambda i: (i, 0)),
                # weights / biases: constant block index -> VMEM resident
                pl.BlockSpec((in_dim, 128), lambda i: (0, 0)),
                pl.BlockSpec((1, 128), lambda i: (0, 0)),
                pl.BlockSpec((128, PAD_HID), lambda i: (0, 0)),
                pl.BlockSpec((1, PAD_HID), lambda i: (0, 0)),
                pl.BlockSpec((PAD_HID, PAD_CLS), lambda i: (0, 0)),
                pl.BlockSpec((1, PAD_CLS), lambda i: (0, 0)),
            ],
            out_specs=pl.BlockSpec((TB, PAD_CLS), lambda i: (i, 0)),
        ),
        compiler_params=pltpu.CompilerParams(
            dimension_semantics=("parallel",),
            vmem_limit_bytes=32 * 1024 * 1024,
        ),
        cost_estimate=pl.CostEstimate(
            flops=flops,
            transcendentals=B * PAD_CLS,
            bytes_accessed=bytes_accessed,
        ),
    )(x, w1b, b1f, w2b, b2f, w3b, b3f)

    if return_padded:
        return out                       # (B, 128) bf16, padded classes are 0
    return out[:, :n_cls]                # (B, 10) bf16


def init_params(key):
    """Deterministic PyTorch-style init: U(-1/sqrt(fan_in), 1/sqrt(fan_in))."""
    dims = [(784, 128), (128, 64), (64, 10)]
    params = []
    for fan_in, fan_out in dims:
        kw, kb, key = jax.random.split(key, 3)
        bound = 1.0 / jnp.sqrt(jnp.float32(fan_in))
        w = jax.random.uniform(kw, (fan_in, fan_out), jnp.float32, -bound, bound)
        b = jax.random.uniform(kb, (1, fan_out), jnp.float32, -bound, bound)
        params.extend([w, b])
    return tuple(params)


def _reference_forward(x_nchw, params):
    """Pure-JAX f32 reference for correctness checking."""
    w1, b1, w2, b2, w3, b3 = params
    x = x_nchw.reshape(x_nchw.shape[0], -1).astype(jnp.float32)
    h1 = jnp.maximum(x @ w1 + b1, 0.0)
    h2 = jnp.maximum(h1 @ w2 + b2, 0.0)
    logits = h2 @ w3 + b3
    return jax.nn.softmax(logits, axis=-1)


if __name__ == "__main__":
    key = jax.random.PRNGKey(0)
    k_x, k_p = jax.random.split(key)

    B = 2
    x = jax.random.normal(k_x, (B, 1, 28, 28), jnp.float32)   # NCHW, MNIST-like
    params = init_params(k_p)

    out = my_awesome_model_forward(x, params)
    out = jax.block_until_ready(out)

    # sanity: shape, rows ~sum to 1 (approx reciprocal + bf16 -> loose tol),
    # and agreement with the f32 reference.
    out_f32 = out.astype(jnp.float32)
    assert out.shape == (B, 10)
    assert bool(jnp.all(jnp.abs(jnp.sum(out_f32, axis=1) - 1.0) < 1e-2))
    ref = _reference_forward(x, params)
    assert bool(jnp.max(jnp.abs(out_f32 - ref)) < 5e-2)
    print("KERNEL_OK")
</pallas_src>

<mosaic_0001>
module attributes {stable_mosaic.version = 11 : i64} {
  func.func @mlp_kernel(%arg0: i32, %arg1: memref<2x784xf32, #tpu.memory_space<vmem>>, %arg2: memref<784x128xbf16, #tpu.memory_space<vmem>>, %arg3: memref<1x128xf32, #tpu.memory_space<vmem>>, %arg4: memref<128x128xbf16, #tpu.memory_space<vmem>>, %arg5: memref<1x128xf32, #tpu.memory_space<vmem>>, %arg6: memref<128x128xbf16, #tpu.memory_space<vmem>>, %arg7: memref<1x128xf32, #tpu.memory_space<vmem>>, %arg8: memref<2x128xbf16, #tpu.memory_space<vmem>>) attributes {dimension_semantics = [#tpu.dimension_semantics<parallel>], iteration_bounds = array<i64: 1>, scalar_prefetch = 0 : i64, scratch_operands = 0 : i64, tpu.core_type = #tpu.core_type<tc>, window_params = [{transform_indices = @transform_0, window_bounds = array<i64: 2, 784>}, {pipeline_mode = #tpu.pipeline_mode<synchronous>, transform_indices = @transform_1, window_bounds = array<i64: 784, 128>}, {pipeline_mode = #tpu.pipeline_mode<synchronous>, transform_indices = @transform_2, window_bounds = array<i64: 1, 128>}, {pipeline_mode = #tpu.pipeline_mode<synchronous>, transform_indices = @transform_3, window_bounds = array<i64: 128, 128>}, {pipeline_mode = #tpu.pipeline_mode<synchronous>, transform_indices = @transform_4, window_bounds = array<i64: 1, 128>}, {pipeline_mode = #tpu.pipeline_mode<synchronous>, transform_indices = @transform_5, window_bounds = array<i64: 128, 128>}, {pipeline_mode = #tpu.pipeline_mode<synchronous>, transform_indices = @transform_6, window_bounds = array<i64: 1, 128>}, {transform_indices = @transform_7, window_bounds = array<i64: 2, 128>}]} {
    %c0 = arith.constant 0 : index
    %c0_0 = arith.constant 0 : index
    %0 = vector.load %arg1[%c0, %c0_0] : memref<2x784xf32, #tpu.memory_space<vmem>>, vector<2x784xf32>
    %1 = arith.truncf %0 : vector<2x784xf32> to vector<2x784xbf16>
    %c0_1 = arith.constant 0 : index
    %c0_2 = arith.constant 0 : index
    %2 = vector.load %arg2[%c0_1, %c0_2] : memref<784x128xbf16, #tpu.memory_space<vmem>>, vector<784x128xbf16>
    %cst = arith.constant dense<0.000000e+00> : vector<2x128xf32>
    %3 = tpu.matmul %1, %2, %cst {dimension_numbers = #tpu.dot_dimension_numbers<[1], [0], [0], [1], [0, 0, 1, 1], [], []>} : vector<2x784xbf16>, vector<784x128xbf16>, vector<2x128xf32> -> vector<2x128xf32>
    %c0_3 = arith.constant 0 : index
    %c0_4 = arith.constant 0 : index
    %4 = vector.load %arg3[%c0_3, %c0_4] : memref<1x128xf32, #tpu.memory_space<vmem>>, vector<1x128xf32>
    %5 = vector.broadcast %4 : vector<1x128xf32> to vector<2x128xf32>
    %6 = arith.addf %3, %5 : vector<2x128xf32>
    %cst_5 = arith.constant 0.000000e+00 : f32
    %7 = vector.broadcast %cst_5 : f32 to vector<2x128xf32>
    %8 = arith.maximumf %6, %7 : vector<2x128xf32>
    %9 = arith.truncf %8 : vector<2x128xf32> to vector<2x128xbf16>
    %c0_6 = arith.constant 0 : index
    %c0_7 = arith.constant 0 : index
    %10 = vector.load %arg4[%c0_6, %c0_7] : memref<128x128xbf16, #tpu.memory_space<vmem>>, vector<128x128xbf16>
    %cst_8 = arith.constant dense<0.000000e+00> : vector<2x128xf32>
    %11 = tpu.matmul %9, %10, %cst_8 {dimension_numbers = #tpu.dot_dimension_numbers<[1], [0], [0], [1], [0, 0, 1, 1], [], []>} : vector<2x128xbf16>, vector<128x128xbf16>, vector<2x128xf32> -> vector<2x128xf32>
    %c0_9 = arith.constant 0 : index
    %c0_10 = arith.constant 0 : index
    %12 = vector.load %arg5[%c0_9, %c0_10] : memref<1x128xf32, #tpu.memory_space<vmem>>, vector<1x128xf32>
    %13 = vector.broadcast %12 : vector<1x128xf32> to vector<2x128xf32>
    %14 = arith.addf %11, %13 : vector<2x128xf32>
    %cst_11 = arith.constant 0.000000e+00 : f32
    %15 = vector.broadcast %cst_11 : f32 to vector<2x128xf32>
    %16 = arith.maximumf %14, %15 : vector<2x128xf32>
    %17 = arith.truncf %16 : vector<2x128xf32> to vector<2x128xbf16>
    %c0_12 = arith.constant 0 : index
    %c0_13 = arith.constant 0 : index
    %18 = vector.load %arg6[%c0_12, %c0_13] : memref<128x128xbf16, #tpu.memory_space<vmem>>, vector<128x128xbf16>
    %cst_14 = arith.constant dense<0.000000e+00> : vector<2x128xf32>
    %19 = tpu.matmul %17, %18, %cst_14 {dimension_numbers = #tpu.dot_dimension_numbers<[1], [0], [0], [1], [0, 0, 1, 1], [], []>} : vector<2x128xbf16>, vector<128x128xbf16>, vector<2x128xf32> -> vector<2x128xf32>
    %c0_15 = arith.constant 0 : index
    %c0_16 = arith.constant 0 : index
    %20 = vector.load %arg7[%c0_15, %c0_16] : memref<1x128xf32, #tpu.memory_space<vmem>>, vector<1x128xf32>
    %21 = vector.broadcast %20 : vector<1x128xf32> to vector<2x128xf32>
    %22 = arith.addf %19, %21 : vector<2x128xf32>
    %cst_17 = arith.constant dense<0xFF800000> : vector<2xf32>
    %23 = vector.multi_reduction <maximumf>, %22, %cst_17 [1] : vector<2x128xf32> to vector<2xf32>
    %24 = vector.shape_cast %23 : vector<2xf32> to vector<2x1xf32>
    %25 = vector.broadcast %24 : vector<2x1xf32> to vector<2x128xf32>
    %26 = arith.subf %22, %25 : vector<2x128xf32>
    %27 = math.exp %26 : vector<2x128xf32>
    %cst_18 = arith.constant dense<0.000000e+00> : vector<2xf32>
    %28 = vector.multi_reduction <add>, %27, %cst_18 [1] : vector<2x128xf32> to vector<2xf32>
    %29 = vector.shape_cast %28 : vector<2xf32> to vector<2x1xf32>
    %30 = tpu.reciprocal %29 {approx = true} : vector<2x1xf32> -> vector<2x1xf32>
    %31 = vector.broadcast %30 : vector<2x1xf32> to vector<2x128xf32>
    %32 = arith.mulf %27, %31 : vector<2x128xf32>
    %33 = arith.truncf %32 : vector<2x128xf32> to vector<2x128xbf16>
    %c0_19 = arith.constant 0 : index
    %c0_20 = arith.constant 0 : index
    %34 = vector.load %arg8[%c0_19, %c0_20] : memref<2x128xbf16, #tpu.memory_space<vmem>>, vector<2x128xbf16>
    tpu.vector_store %arg8[%c0_19, %c0_20], %33 {strides = array<i32>} : memref<2x128xbf16, #tpu.memory_space<vmem>>, vector<2x128xbf16>,
    return
  }
  func.func @transform_0(%arg0: i32) -> (i32, i32) {
    %c0_i32 = arith.constant 0 : i32
    %c0_i32_0 = arith.constant 0 : i32
    return %arg0, %c0_i32 : i32, i32
  }
  func.func @transform_1(%arg0: i32) -> (i32, i32) {
    %c0_i32 = arith.constant 0 : i32
    %c0_i32_0 = arith.constant 0 : i32
    %c0_i32_1 = arith.constant 0 : i32
    return %c0_i32, %c0_i32_0 : i32, i32
  }
  func.func @transform_2(%arg0: i32) -> (i32, i32) {
    %c0_i32 = arith.constant 0 : i32
    %c0_i32_0 = arith.constant 0 : i32
    %c0_i32_1 = arith.constant 0 : i32
    return %c0_i32, %c0_i32_0 : i32, i32
  }
  func.func @transform_3(%arg0: i32) -> (i32, i32) {
    %c0_i32 = arith.constant 0 : i32
    %c0_i32_0 = arith.constant 0 : i32
    %c0_i32_1 = arith.constant 0 : i32
    return %c0_i32, %c0_i32_0 : i32, i32
  }
  func.func @transform_4(%arg0: i32) -> (i32, i32) {
    %c0_i32 = arith.constant 0 : i32
    %c0_i32_0 = arith.constant 0 : i32
    %c0_i32_1 = arith.constant 0 : i32
    return %c0_i32, %c0_i32_0 : i32, i32
  }
  func.func @transform_5(%arg0: i32) -> (i32, i32) {
    %c0_i32 = arith.constant 0 : i32
    %c0_i32_0 = arith.constant 0 : i32
    %c0_i32_1 = arith.constant 0 : i32
    return %c0_i32, %c0_i32_0 : i32, i32
  }
  func.func @transform_6(%arg0: i32) -> (i32, i32) {
    %c0_i32 = arith.constant 0 : i32
    %c0_i32_0 = arith.constant 0 : i32
    %c0_i32_1 = arith.constant 0 : i32
    return %c0_i32, %c0_i32_0 : i32, i32
  }
  func.func @transform_7(%arg0: i32) -> (i32, i32) {
    %c0_i32 = arith.constant 0 : i32
    %c0_i32_0 = arith.constant 0 : i32
    return %arg0, %c0_i32 : i32, i32
  }
}

</mosaic_0001>

<bundles_post_ra>
// kernel: tpu_custom_call.1
= control target key start
LH: loop header
LB: loop body
LE: loop exit
PB: predicated region body
PF: predicated region fallthrough
CT: control target
= control target key end

     0   :  { %12 = vsyncpa [#allocation3], 0  ;;  %s1346_s0 = inlined_call_operand.hbm [shape: f32[2,784], index: 0, kind: input, shape index: {}]   ;;  %s1347_s1 = inlined_call_operand.hbm [shape: bf16[784,128], index: 1, kind: input, shape index: {}]   ;;  %s1348_s2 = inlined_call_operand.vmem [shape: f32[1,128], index: 2, kind: input, shape index: {}]   ;;  %s1349_s3 = inlined_call_operand.hbm [shape: bf16[128,128], index: 3, kind: input, shape index: {}]   ;;  %s1350_s4 = inlined_call_operand.vmem [shape: f32[1,128], index: 4, kind: input, shape index: {}]   ;;  %s1351_s5 = inlined_call_operand.hbm [shape: bf16[128,128], index: 5, kind: input, shape index: {}]   ;;  %s1352_s6 = inlined_call_operand.vmem [shape: f32[1,128], index: 6, kind: input, shape index: {}]   ;;  %s1353_s7 = inlined_call_operand.hbm [shape: bf16[2,128], index: 7, kind: output, shape index: {}]  }
   0x1   :  { %13 = vsyncpa [#allocation6], 0 }
   0x2   :  { %14 = vsyncpa [#allocation9], 0  ;;  %s31_s26 = sshll.u32 %s1347_s1, 4  ;;  %s32_s26 = int_to_ptr.hbm [resolvable:$true] %s31_s26 }
   0x3   :  { %15 = vsyncpa [#allocation4], 0  ;;  %s1275_s27 = smov [#allocation5]   ;;  %s21_s8 = sshll.u32 %s1346_s0, 4  ;;  %s22_s8 = int_to_ptr.hbm [resolvable:$true] %s21_s8 }
   0x4   :  { %s33_s28 = sshll.u32 %s1275_s27, 4  ;;  %s1276_s9 = smov 64   ;;  %s34_s28 = int_to_ptr.vmem [resolvable:$true] %s33_s28 }
   0x5   :  { %s1277_s10 = smov 4   ;;  %s1278_s11 = smov [#allocation2]  }
   0x6   :  { %39 = dma.hbm_to_vmem [thread:$0]  %s32_s26, 6272, %s34_s28, [#allocation6], %s1276_s9, %s1276_s9, %s1277_s10  }
   0x7   :  { %s23_s12 = sshll.u32 %s1278_s11, 4  ;;  %s46_s15 = sshll.u32 %s1349_s3, 4  ;;  %s24_s12 = int_to_ptr.vmem [resolvable:$true] %s23_s12  ;;  %s47_s15 = int_to_ptr.hbm [resolvable:$true] %s46_s15 }
   0x8   :  { %26 = dma.hbm_to_vmem [thread:$0]  %s22_s8, 224, %s24_s12, [#allocation3]  }
   0x9   :  { %s61_s17 = sshll.u32 %s1351_s5, 4  ;;  %s1279_s18 = smov [#allocation7]   ;;  %s62_s17 = int_to_ptr.hbm [resolvable:$true] %s61_s17 }
   0xa   :  { %s48_s19 = sshll.u32 %s1279_s18, 4  ;;  %s1280_s0 = smov [#allocation8]   ;;  %s49_s19 = int_to_ptr.vmem [resolvable:$true] %s48_s19 }
   0xb   :  { %54 = dma.hbm_to_vmem [thread:$0]  %s47_s15, 1024, %s49_s19, [#allocation6], %s1276_s9, %s1276_s9, %s1277_s10  }
   0xc   :  { %s63_s20 = sshll.u32 %s1280_s0, 4  ;;  %s64_s20 = int_to_ptr.vmem [resolvable:$true] %s63_s20 }
   0xd   :  { %69 = dma.hbm_to_vmem [thread:$0]  %s62_s17, 1024, %s64_s20, [#allocation9], %s1276_s9, %s1276_s9, %s1277_s10  }
   0xe   :  { %1267 = dma.done.wait [#allocation3], 224  }
   0xf   :  { %1268 = vsyncadd [#allocation3], 4294967072 }
  0x10   :  { %1269 = dma.done.wait [#allocation6], 7296  }
  0x11   :  { %1270 = vsyncadd [#allocation6], 4294960000 }
  0x12   :  { %1271 = dma.done.wait [#allocation9], 1024  }
  0x13   :  { %1272 = vsyncadd [#allocation9], 4294966272  ;;  %v1075_v0 = vld [vmem:[#allocation5 + $0x38] sm:$0xff]  ;;  %v1074_v3 = vld [vmem:[#allocation5 + $0x30] sm:$0xff]  ;;  %vm513_vm0 = vcmask 130048   ;;  %vm774_vm1 = vcmask 1041408  }
  0x14   :  { %v1083_v1 = vld [vmem:[#allocation5 + $0x78] sm:$0xff]  ;;  %517 = vmatpush.bf16.msra.mxu0 %v1075_v0  ;;  %v1082_v4 = vld [vmem:[#allocation5 + $0x70] sm:$0xff]  ;;  %v1073_v8 = vld [vmem:[#allocation5 + $0x28] sm:$0xff]  ;;  %s795_s26 = sshll.u32 %s1353_s7, 4  ;;  %s796_s26 = int_to_ptr.hbm [resolvable:$true] %s795_s26 }
  0x15   :  { %v1091_v2 = vld [vmem:[#allocation5 + $0xb8] sm:$0xff]  ;;  %530 = vmatpush.bf16.msra.mxu1 %v1083_v1  ;;  %v1090_v5 = vld [vmem:[#allocation5 + $0xb0] sm:$0xff]  ;;  %v1081_v9 = vld [vmem:[#allocation5 + $0x68] sm:$0xff] }
  0x16   :  { %543 = vmatpush.bf16.msra.mxu2 %v1091_v2  ;;  %v1099_v6 = vld [vmem:[#allocation5 + $0xf8] sm:$0xff]  ;;  %v1098_v7 = vld [vmem:[#allocation5 + $0xf0] sm:$0xff]  ;;  %v1089_v10 = vld [vmem:[#allocation5 + $0xa8] sm:$0xff] }
  0x17   :  { %556 = vmatpush.bf16.msra.mxu3 %v1099_v6  ;;  %v1097_v11 = vld [vmem:[#allocation5 + $0xe8] sm:$0xff]  ;;  %v1072_v12 = vld [vmem:[#allocation5 + $0x20] sm:$0xff]  ;;  %v89_v15 = vld [vmem:[#allocation2] sm:$0xff] }
  0x18   :  { %518 = vmatpush.bf16.msra.mxu0 %v1074_v3  ;;  %v1080_v13 = vld [vmem:[#allocation5 + $0x60] sm:$0xff]  ;;  %93 = vst [vmem:[#allocation1] ss:$4 sm:$0xff] %v89_v15  ;;  %v1071_v17 = vld [vmem:[#allocation5 + $0x18] sm:$0xff]  ;;  %v1070_v22 = vld [vmem:[#allocation5 + $0x10] sm:$0xff] }
  0x19   :  { %531 = vmatpush.bf16.msra.mxu1 %v1082_v4  ;;  %v1088_v14 = vld [vmem:[#allocation5 + $0xa0] sm:$0xff]  ;;  %v1079_v18 = vld [vmem:[#allocation5 + $0x58] sm:$0xff]  ;;  %v1078_v23 = vld [vmem:[#allocation5 + $0x50] sm:$0xff] }
  0x1a   :  { %544 = vmatpush.bf16.msra.mxu2 %v1090_v5  ;;  %v1096_v16 = vld [vmem:[#allocation5 + $0xe0] sm:$0xff]  ;;  %v90_v19 = vld [vmem:[#allocation2 + $0x8] sm:$0x3f]  ;;  %v1086_v24 = vld [vmem:[#allocation5 + $0x90] sm:$0xff] }
  0x1b   :  { %557 = vmatpush.bf16.msra.mxu3 %v1098_v7  ;;  %v1087_v20 = vld [vmem:[#allocation5 + $0x98] sm:$0xff]  ;;  %95 = vst [vmem:[#allocation1 + $0x20] ss:$4 sm:$0xff] %v90_v19  ;;  %v1094_v25 = vld [vmem:[#allocation5 + $0xd0] sm:$0xff]  ;;  %v1069_v26 = vld [vmem:[#allocation5 + $0x8] sm:$0xff] }
  0x1c   :  { %519 = vmatpush.bf16.msra.mxu0 %v1073_v8  ;;  %v1095_v21 = vld [vmem:[#allocation5 + $0xd8] sm:$0xff]  ;;  %v1077_v27 = vld [vmem:[#allocation5 + $0x48] sm:$0xff]  ;;  %v1068_v29 = vld [vmem:[#allocation5] sm:$0xff] }
  0x1d   :  { %532 = vmatpush.bf16.msra.mxu1 %v1081_v9  ;;  %v1085_v28 = vld [vmem:[#allocation5 + $0x88] sm:$0xff]  ;;  %v1076_v30 = vld [vmem:[#allocation5 + $0x40] sm:$0xff]  ;;  %v1107_v34 = vld [vmem:[#allocation5 + $0x138] sm:$0xff] }
  0x1e   :  { %545 = vmatpush.bf16.msra.mxu2 %v1089_v10  ;;  %v1093_v31 = vld [vmem:[#allocation5 + $0xc8] sm:$0xff]  ;;  %v1115_v35 = vld [vmem:[#allocation5 + $0x178] sm:$0xff]  ;;  %v1084_v36 = vld [vmem:[#allocation5 + $0x80] sm:$0xff] }
  0x1f   :  { %558 = vmatpush.bf16.msra.mxu3 %v1097_v11  ;;  %v96_v32 = vld.sshfl [vmem:[#allocation1] sm:$0xff pattern:$0x73625140]  ;;  %v97_v33 = vld.sshfl [vmem:[#allocation1 + $0x8] sm:$0xff pattern:$0x73625140] }
  0x20   :  { %520 = vmatpush.bf16.msra.mxu0 %v1072_v12  ;;  %v98_v37 = vld.sshfl [vmem:[#allocation1 + $0x10] sm:$0xff pattern:$0x73625140]  ;;  %v110_v38 = vpack.c.bf16 %v96_v32, %v96_v32  ;;  %v111_v39 = vpack.c.bf16 %v97_v33, %v97_v33  ;;  %v99_v42 = vld.sshfl [vmem:[#allocation1 + $0x18] sm:$0xff pattern:$0x73625140] }
  0x21   :  { %533 = vmatpush.bf16.msra.mxu1 %v1080_v13  ;;  %v1092_v40 = vld [vmem:[#allocation5 + $0xc0] sm:$0xff]  ;;  %v1106_v43 = vld [vmem:[#allocation5 + $0x130] sm:$0xff]  ;;  %v112_v45 = vpack.c.bf16 %v98_v37, %v98_v37  ;;  %v113_v46 = vpack.c.bf16 %v99_v42, %v99_v42  ;;  %v1105_v47 = vld [vmem:[#allocation5 + $0x128] sm:$0xff] }
  0x22   :  { %546 = vmatpush.bf16.msra.mxu2 %v1088_v14  ;;  %v1116_v41 = vld [vmem:[#allocation5 + $0x180] sm:$0xff]  ;;  %v1114_v44 = vld [vmem:[#allocation5 + $0x170] sm:$0xff]  ;;  %v1113_v48 = vld [vmem:[#allocation5 + $0x168] sm:$0xff] }
  0x23   :  { %559 = vmatpush.bf16.msra.mxu3 %v1096_v16  ;;  %v1104_v49 = vld [vmem:[#allocation5 + $0x120] sm:$0xff]  ;;  %v1103_v51 = vld [vmem:[#allocation5 + $0x118] sm:$0xff]  ;;  %v1102_v54 = vld [vmem:[#allocation5 + $0x110] sm:$0xff] }
  0x24   :  { %521 = vmatpush.bf16.msra.mxu0 %v1071_v17  ;;  %v1112_v50 = vld [vmem:[#allocation5 + $0x160] sm:$0xff]  ;;  %v1111_v52 = vld [vmem:[#allocation5 + $0x158] sm:$0xff]  ;;  %v1110_v55 = vld [vmem:[#allocation5 + $0x150] sm:$0xff] }
  0x25   :  { %534 = vmatpush.bf16.msra.mxu1 %v1079_v18  ;;  %v102_v53 = vld.sshfl [vmem:[#allocation1 + $0x30] sm:$0xff pattern:$0x73625140]  ;;  %v1101_v57 = vld [vmem:[#allocation5 + $0x108] sm:$0xff]  ;;  %v1122_v3 = vld [vmem:[#allocation7 + $0x28] sm:$0xff] }
  0x26   :  { %547 = vmatpush.bf16.msra.mxu2 %v1087_v20  ;;  %v116_v56 = vpack.c.bf16 %v102_v53, %v102_v53  ;;  %v1109_v58 = vld [vmem:[#allocation5 + $0x148] sm:$0xff]  ;;  %v1100_v59 = vld [vmem:[#allocation5 + $0x100] sm:$0xff]  ;;  %v101_v62 = vld.sshfl [vmem:[#allocation1 + $0x28] sm:$0xff pattern:$0x73625140] }
  0x27   :  { %560 = vmatpush.bf16.msra.mxu3 %v1095_v21  ;;  %v1108_v60 = vld [vmem:[#allocation5 + $0x140] sm:$0xff]  ;;  %v100_v61 = vld.sshfl [vmem:[#allocation1 + $0x20] sm:$0xff pattern:$0x73625140]  ;;  %v115_v0 = vpack.c.bf16 %v101_v62, %v101_v62  ;;  %v1123_v2 = vld [vmem:[#allocation7 + $0x30] sm:$0xff] }
  0x28   :  { %522 = vmatpush.bf16.msra.mxu0 %v1070_v22  ;;  %v114_v63 = vpack.c.bf16 %v100_v61, %v100_v61  ;;  %v1124_v1 = vld [vmem:[#allocation7 + $0x38] sm:$0xff]  ;;  %v1121_v4 = vld [vmem:[#allocation7 + $0x20] sm:$0xff]  ;;  %v1119_v6 = vld [vmem:[#allocation7 + $0x10] sm:$0xff] }
  0x29   :  { %535 = vmatpush.bf16.msra.mxu1 %v1078_v23  ;;  %v1120_v5 = vld [vmem:[#allocation7 + $0x18] sm:$0xff]  ;;  %v1118_v7 = vld [vmem:[#allocation7 + $0x8] sm:$0xff]  ;;  %v1117_v10 = vld [vmem:[#allocation7] sm:$0xff] }
  0x2a   :  { %548 = vmatpush.bf16.msra.mxu2 %v1086_v24  ;;  %v1132_v13 = vld [vmem:[#allocation8 + $0x38] sm:$0xff]  ;;  %v1131_v16 = vld [vmem:[#allocation8 + $0x30] sm:$0xff]  ;;  %v1140_v17 = vld [vmem:[%s1348_s2] ss:$0 sm:$0xff] }
  0x2b   :  { %561 = vmatpush.bf16.msra.mxu3 %v1094_v25  ;;  %v1130_v18 = vld [vmem:[#allocation8 + $0x28] sm:$0xff]  ;;  %v1129_v22 = vld [vmem:[#allocation8 + $0x20] sm:$0xff]  ;;  %v1128_v24 = vld [vmem:[#allocation8 + $0x18] sm:$0xff] }
  0x2c   :  { %523 = vmatpush.bf16.msra.mxu0 %v1069_v26 }
  0x2d   :  { %536 = vmatpush.bf16.msra.mxu1 %v1077_v27  ;;  %v1127_v27 = vld [vmem:[#allocation8 + $0x10] sm:$0xff] }
  0x2e   :  { %549 = vmatpush.bf16.msra.mxu2 %v1085_v28 }
  0x2f   :  { %562 = vmatpush.bf16.msra.mxu3 %v1093_v31 }
  0x30   :  { %524 = vmatpush.bf16.msra.mxu0 %v1068_v29 }
  0x31   :  { %537 = vmatpush.bf16.msra.mxu1 %v1076_v30 }
  0x32   :  { %550 = vmatpush.bf16.msra.mxu2 %v1084_v36 }
  0x33   :  { %525 = vmatmul.bf16.vlgmr.msra.gmra.mxu0 %v110_v38  ;;  %563 = vmatpush.bf16.msra.mxu3 %v1092_v40  ;;  %v1125_v40 = vld [vmem:[#allocation8] sm:$0xff] }
  0x34   :  { %569 = vmatpush.bf16.msrb.mxu0 %v1107_v34  ;;  %538 = vmatmul.bf16.vlgmr.msra.gmra.mxu1 %v111_v39  ;;  %v1126_v39 = vld [vmem:[#allocation8 + $0x8] sm:$0xff] }
  0x35   :  { %582 = vmatpush.bf16.msrb.mxu1 %v1115_v35  ;;  %551 = vmatmul.bf16.vlgmr.msra.gmra.mxu2 %v112_v45 }
  0x36   :  { %602 = vmatpush.bf16.msrb.mxu2 %v1116_v41  ;;  %564 = vmatmul.bf16.vlgmr.msra.gmra.mxu3 %v113_v46  ;;  %v1141_v41 = vld [vmem:[%s1350_s4] ss:$0 sm:$0xff]  ;;  %s1281_s4 = smov [#allocation10]  }
  0x37   :  { %678 = vmatpush.bf16.msrb.mxu3 %v1124_v1  ;;  %s793_s24 = sshll.u32 %s1281_s4, 4  ;;  %s794_s24 = int_to_ptr.vmem [resolvable:$true] %s793_s24 }
  0x38   :  { %570 = vmatpush.bf16.msrb.mxu0 %v1106_v43 }
  0x39   :  { %583 = vmatpush.bf16.msrb.mxu1 %v1114_v44 }
  0x3a   :  { %761 = vmatpush.bf16.msra.mxu2 %v1132_v13 }
  0x3b   :  { %679 = vmatpush.bf16.msrb.mxu3 %v1123_v2 }
  0x3c   :  { %571 = vmatpush.bf16.msrb.mxu0 %v1105_v47  ;;  %v1142_v47 = vld [vmem:[%s1352_s6] ss:$0 sm:$0xff] }
  0x3d   :  { %584 = vmatpush.bf16.msrb.mxu1 %v1113_v48 }
  0x3e   :  { %762 = vmatpush.bf16.msra.mxu2 %v1131_v16 }
  0x3f   :  { %680 = vmatpush.bf16.msrb.mxu3 %v1122_v3 }
  0x40   :  { %572 = vmatpush.bf16.msrb.mxu0 %v1104_v49 }
  0x41   :  { %585 = vmatpush.bf16.msrb.mxu1 %v1112_v50 }
  0x42   :  { %763 = vmatpush.bf16.msra.mxu2 %v1130_v18 }
  0x43   :  { %681 = vmatpush.bf16.msrb.mxu3 %v1121_v4 }
  0x44   :  { %573 = vmatpush.bf16.msrb.mxu0 %v1103_v51 }
  0x45   :  { %586 = vmatpush.bf16.msrb.mxu1 %v1111_v52  ;;  %1003 = vmatmul.msk.bf16.vlgmr.msrb.gmra.mxu2 %vm513_vm0, %v116_v56 }
  0x46   :  { %764 = vmatpush.bf16.msra.mxu2 %v1129_v22 }
  0x47   :  { %682 = vmatpush.bf16.msrb.mxu3 %v1120_v5 }
  0x48   :  { %574 = vmatpush.bf16.msrb.mxu0 %v1102_v54 }
  0x49   :  { %587 = vmatpush.bf16.msrb.mxu1 %v1110_v55 }
  0x4a   :  { %765 = vmatpush.bf16.msra.mxu2 %v1128_v24 }
  0x4b   :  { %683 = vmatpush.bf16.msrb.mxu3 %v1119_v6 }
  0x4c   :  { %575 = vmatpush.bf16.msrb.mxu0 %v1101_v57 }
  0x4d   :  { %588 = vmatpush.bf16.msrb.mxu1 %v1109_v58 }
  0x4e   :  { %766 = vmatpush.bf16.msra.mxu2 %v1127_v27 }
  0x4f   :  { %684 = vmatpush.bf16.msrb.mxu3 %v1118_v7 }
  0x50   :  { %576 = vmatpush.bf16.msrb.mxu0 %v1100_v59 }
  0x51   :  { %589 = vmatpush.bf16.msrb.mxu1 %v1108_v60 }
  0x52   :  { %767 = vmatpush.bf16.msra.mxu2 %v1126_v39 }
  0x53   :  { %577 = vmatmul.bf16.vlgmr.msrb.gmra.mxu0 %v114_v63  ;;  %685 = vmatpush.bf16.msrb.mxu3 %v1117_v10 }
  0x54   :  { %590 = vmatmul.bf16.vlgmr.msrb.gmra.mxu1 %v115_v0 }
  0x56   :  { %768 = vmatpush.bf16.msra.mxu2 %v1125_v40 }
  0xb0   :  { %v526_v8 = vpop.f32.mrf.mxu0 }
  0xb1   :  { %v539_v9 = vpop.f32.mrf.mxu1  ;;  %v527_v19 = vadd.f32 %v1140_v17, %v526_v8 }
  0xb3   :  { %v540_v23 = vadd.f32 %v539_v9, %v527_v19 }
  0xb8   :  { %v528_v11 = vpop.f32.mrf.mxu0  ;;  %v552_v14 = vpop.f32.mrf.mxu2 }
  0xb9   :  { %v541_v12 = vpop.f32.mrf.mxu1  ;;  %v565_v15 = vpop.f32.mrf.mxu3  ;;  %v553_v25 = vadd.f32 %v552_v14, %v540_v23 }
  0xbb   :  { %v566_v28 = vadd.f32 %v565_v15, %v553_v25 }
  0xc0   :  { %v554_v20 = vpop.f32.mrf.mxu2 }
  0xc1   :  { %v567_v21 = vpop.f32.mrf.mxu3 }
  0xc8   :  { %v604_v26 = vpop.f32.mrf.mxu2 }
  0xd0   :  { %v578_v29 = vpop.f32.mrf.mxu0  ;;  %v606_v33 = vpop.f32.mrf.mxu2 }
  0xd1   :  { %v591_v30 = vpop.f32.mrf.mxu1  ;;  %v579_v31 = vadd.f32 %v578_v29, %v566_v28 }
  0xd3   :  { %v592_v32 = vadd.f32 %v591_v30, %v579_v31 }
  0xd5   :  { %v605_v34 = vadd.f32 %v604_v26, %v592_v32 }
  0xd7   :  { %v608_v35 = vmax.f32 %v605_v34, 0.0 }
  0xd8   :  { %v580_v36 = vpop.f32.mrf.mxu0 }
  0xd9   :  { %v593_v37 = vpop.f32.mrf.mxu1  ;;  %v609_v38 = vpack.c.bf16 %v608_v35, %v608_v35 }
  0xdb   :  { %686 = vmatmul.bf16.vlgmr.msrb.gmra.mxu3 %v609_v38 }
 0x15e   :  { %v687_v42 = vpop.f32.mrf.mxu3 }
 0x15f   :  { %v688_v43 = vadd.f32 %v1141_v41, %v687_v42 }
 0x161   :  { %v691_v44 = vmax.f32 %v688_v43, 0.0 }
 0x163   :  { %v692_v45 = vpack.c.bf16 %v691_v44, %v691_v44 }
 0x165   :  { %769 = vmatmul.bf16.vlgmr.msra.gmra.mxu2 %v692_v45 }
 0x166   :  { %v689_v46 = vpop.f32.mrf.mxu3 }
 0x1e8   :  { %v770_v48 = vpop.f32.mrf.mxu2 }
 0x1e9   :  { %v771_v49 = vadd.f32 %v1142_v47, %v770_v48 }
 0x1eb   :  { %v775_v50 = vsel %vm774_vm1, %v771_v49, -inf }
 0x1ec   :  { %776 = vmax.xlane.f32.xlu0 %v775_v50 }
 0x1f0   :  { %v772_v51 = vpop.f32.mrf.mxu2 }
 0x25f   :  { %v777_v52 = vpop.xlane.xlu0 %776 }
 0x260   :  { %v778_v53 = vsub.f32 %v771_v49, %v777_v52 }
 0x262   :  { %v779_v54 = vmul.f32 1.442695, %v778_v53 }
 0x264   :  { %1143 = vpow2.f32 %v779_v54 }
 0x26a   :  { %v1144_v55 = vpop.eup %1143 }
 0x26b   :  { %v781_v56 = vsel %vm774_vm1, %v1144_v55, 0.0 }
 0x26c   :  { %782 = vadd.xlane.f32.xlu0 %v781_v56 }
 0x2df   :  { %v783_v57 = vpop.xlane.xlu0 %782 }
 0x2e0   :  { %1145 = vrcp.f32 %v783_v57 }
 0x2e6   :  { %v1146_v58 = vpop.eup %1145 }
 0x2e7   :  { %v785_v59 = vmul.f32 %v1146_v58, %v1144_v55 }
 0x2e9   :  { %v786_v60 = vpack.c.bf16 %v785_v59, %v785_v59 }
 0x2eb   :  { %787 = vst [vmem:[#allocation10] sm:$0x1] %v786_v60 }
 0x2ec   :  { %798 = dma.vmem_to_hbm [thread:$0]  %s794_s24, 16, %s796_s26, [#allocation4]  }
 0x2ed   :  { %1273 = dma.done.wait [#allocation4], 16  }
 0x2ee   :  { %1274 = vsyncadd [#allocation4], 4294967280 }
 0x2ef   :  { %803 = vsyncpa [#allocation3], 1 }
 0x2f0   :  { %804 = vsyncpa [#allocation6], 1 }
 0x2f1   :  { %805 = vsyncpa [#allocation9], 1 }
 0x2f2   :  { %806 = vsyncpa [#allocation4], 1 }

</bundles_post_ra>
